<compile_context>
chip_gen: v6e
topology: v6e:2x2x1
jax: 0.10.0
libtpu: 0.0.40
codegen_flags: <defaults>
</compile_context>

<pallas_src>
import functools
import math

import jax
import jax.numpy as jnp
from jax.experimental import pallas as pl
from jax.experimental.pallas import tpu as pltpu


def _round_up(x, m):
    return ((x + m - 1) // m) * m


def _pick_b_tile(batch, t_pad):
    """Batches folded per grid step: target M ~= 256 rows, keep >= 2 grid steps."""
    target_m = 256
    bt = max(1, target_m // t_pad)
    if batch >= 2:
        bt = min(bt, (batch + 1) // 2)      # leave >=2 steps for 2 TCs (v7x)
    bt = min(bt, max(batch, 1))
    return max(bt, 1)


def _ttfs_lif_kernel(x_ref, w_ref, f_ref, v_ref, spike_ref, *, threshold):
    """One grid step = B_TILE batch elements, fully fused as two MXU matmuls.

    x_ref     : VMEM (M, C_in)        flattened (B_TILE*T, C_in) spike counts
    w_ref     : VMEM (C_in, C_out_p)  W.T, zero-padded to lane-dense C_out
    f_ref     : VMEM (M, M)           block-diagonal causal PSP filter
    v_ref     : VMEM (M, C_out_p)     membrane potential (lane-dense store)
    spike_ref : VMEM (M, C_out_p)     heaviside(v - threshold)
    """
    # Linear layer (bias-free):  (M, C_in) @ (C_in, C_out_p)
    y = jnp.dot(x_ref[...], w_ref[...], preferred_element_type=jnp.float32)
    # Causal PSP temporal filter as a matmul:  (M, M) @ (M, C_out_p)
    v = jnp.dot(f_ref[...], y, preferred_element_type=jnp.float32)

    v_ref[...] = v.astype(v_ref.dtype)
    # spikingjelly surrogate.Sigmoid forward == heaviside(x) = (x >= 0)
    spike_ref[...] = jnp.where(v - threshold >= 0.0, 1.0, 0.0).astype(spike_ref.dtype)


def ttfs_lif_linear(threshold, count_t, weight,
                    *, tau=2.0, tau_s=2.0 / 4, v_threshold=1.0, delta=1,
                    mxu_dtype=jnp.float32):
    """Pallas implementation of TTFS_LIF_linear.forward (scalar-threshold branch).

    Args:
      threshold: python float (scalar branch of the module).
      count_t:   (B, C_in, T) float32 — PyTorch layout (N, features, time).
      weight:    (C_out, C_in) float32 — nn.Linear weight (bias=False).
      mxu_dtype: jnp.float32 (default) or jnp.bfloat16 (v6e/v7x MXU fast path,
                 f32 accumulation is kept either way).

    Returns:
      (v_out, spike), both (B, T, C_out) float32 — the module's permuted outputs.
    """
    B, c_in, T = count_t.shape
    c_out = weight.shape[0]

    # Module constants.
    t_max = tau * tau_s * math.log(tau / tau_s) / (tau - tau_s)
    v0 = v_threshold / (math.exp(-t_max / tau) - math.exp(-t_max / tau_s))
    a1_init = math.exp(-delta / tau)
    a2_init = math.exp(-delta / tau_s)
    a1_dec = math.exp(-1.0 / tau)
    a2_dec = math.exp(-1.0 / tau_s)

    # Padded / tiled sizes.
    t_pad = _round_up(T, 8)                     # sublane-aligned time
    c_out_pad = _round_up(c_out, 128)           # lane-dense output stores
    b_tile = _pick_b_tile(B, t_pad)
    b_pad = _round_up(B, b_tile)
    M = b_tile * t_pad                          # matmul rows per grid step
    n_blocks = b_pad // b_tile

    # Causal PSP filter matrix (host-precomputed constant).
    t_idx = jnp.arange(t_pad)
    dt = t_idx[:, None] - t_idx[None, :]                        # t - s
    dt_c = jnp.maximum(dt, 0).astype(jnp.float32)
    filt = jnp.where(dt >= 0,
                     v0 * (a1_init * a1_dec ** dt_c - a2_init * a2_dec ** dt_c),
                     0.0).astype(jnp.float32)                   # (t_pad, t_pad)
    # Block-diagonal over the b_tile batches packed into one grid step.
    filt_blk = jnp.kron(jnp.eye(b_tile, dtype=jnp.float32), filt)   # (M, M)

    # Layout plumbing (no compute hoisting): time-major rows, flat batch*time.
    x = jnp.transpose(count_t, (0, 2, 1)).astype(jnp.float32)       # (B, T, C_in)
    x = jnp.pad(x, ((0, b_pad - B), (0, t_pad - T), (0, 0)))
    x_flat = x.reshape(b_pad * t_pad, c_in)

    w_t = jnp.transpose(weight).astype(jnp.float32)                 # (C_in, C_out)
    w_t = jnp.pad(w_t, ((0, 0), (0, c_out_pad - c_out)))

    if mxu_dtype != jnp.float32:                # optional bf16 MXU path (v6e/v7x)
        x_flat = x_flat.astype(mxu_dtype)
        w_t = w_t.astype(mxu_dtype)
        filt_blk = filt_blk.astype(mxu_dtype)

    kernel = functools.partial(_ttfs_lif_kernel, threshold=float(threshold))

    # Explicit VMEM budget (fits v7x's 64 MiB physical / 32 MiB scoped per TC).
    elt = jnp.dtype(jnp.float32).itemsize
    block_bytes = elt * (M * c_in + c_in * c_out_pad + M * M + 2 * M * c_out_pad)
    vmem_limit = int(min(max(4 * block_bytes, 16 << 20), 32 << 20))

    grid_spec = pltpu.PrefetchScalarGridSpec(
        num_scalar_prefetch=0,
        grid=(n_blocks,),
        in_specs=[
            pl.BlockSpec((M, c_in), lambda b: (b, 0)),              # x rows
            pl.BlockSpec((c_in, c_out_pad), lambda b: (0, 0)),      # W.T (invariant)
            pl.BlockSpec((M, M), lambda b: (0, 0)),                 # filter (invariant)
        ],
        out_specs=[
            pl.BlockSpec((M, c_out_pad), lambda b: (b, 0)),         # v
            pl.BlockSpec((M, c_out_pad), lambda b: (b, 0)),         # spike
        ],
    )

    v_flat, s_flat = pl.pallas_call(
        kernel,
        out_shape=(
            jax.ShapeDtypeStruct((b_pad * t_pad, c_out_pad), jnp.float32),
            jax.ShapeDtypeStruct((b_pad * t_pad, c_out_pad), jnp.float32),
        ),
        grid_spec=grid_spec,
        compiler_params=pltpu.CompilerParams(
            dimension_semantics=("parallel",),
            vmem_limit_bytes=vmem_limit),
    )(x_flat, w_t, filt_blk)

    v_out = v_flat.reshape(b_pad, t_pad, c_out_pad)[:B, :T, :c_out]
    spike = s_flat.reshape(b_pad, t_pad, c_out_pad)[:B, :T, :c_out]
    return v_out, spike


def _reference(threshold, count_t, weight,
               *, tau=2.0, tau_s=2.0 / 4, v_threshold=1.0, delta=1):
    """Pure-JAX reference mirroring the PyTorch forward (sanity check)."""
    t_max = tau * tau_s * math.log(tau / tau_s) / (tau - tau_s)
    v0 = v_threshold / (math.exp(-t_max / tau) - math.exp(-t_max / tau_s))
    T = count_t.shape[2]
    psp1 = math.exp(-delta / tau) * count_t
    psp2 = math.exp(-delta / tau_s) * count_t
    p1 = [psp1[:, :, 0]]
    p2 = [psp2[:, :, 0]]
    for t in range(1, T):
        p1.append(psp1[:, :, t] + p1[-1] * math.exp(-1.0 / tau))
        p2.append(psp2[:, :, t] + p2[-1] * math.exp(-1.0 / tau_s))
    psp1 = jnp.stack(p1, axis=2)
    psp2 = jnp.stack(p2, axis=2)
    u = v0 * (psp1 - psp2)                                    # (B, C_in, T)
    v_out = jnp.einsum('bit,oi->bot', u, weight)              # (B, C_out, T)
    spike = jnp.where(v_out - threshold >= 0.0, 1.0, 0.0)
    return jnp.transpose(v_out, (0, 2, 1)), jnp.transpose(spike, (0, 2, 1))


if __name__ == "__main__":
    key = jax.random.PRNGKey(0)
    k_x, k_w = jax.random.split(key)

    B, C_IN, T, C_OUT = 2, 32, 8, 16
    # count_t: spike counts over time, PyTorch layout (B, in_features, T)
    count_t = jax.random.bernoulli(k_x, 0.3, (B, C_IN, T)).astype(jnp.float32)
    # nn.Linear(in_features, out_features, bias=False) weight, kaiming-uniform-like
    bound = 1.0 / math.sqrt(C_IN)
    weight = jax.random.uniform(k_w, (C_OUT, C_IN), jnp.float32, -bound, bound)
    threshold = 0.5

    v_out, spike = ttfs_lif_linear(threshold, count_t, weight)
    jax.block_until_ready((v_out, spike))

    v_ref, s_ref = _reference(threshold, count_t, weight)
    assert v_out.shape == (B, T, C_OUT) and spike.shape == (B, T, C_OUT)
    assert float(jnp.max(jnp.abs(v_out - v_ref))) < 1e-3
    # Spikes must match wherever the reference potential is not sitting exactly
    # at the threshold boundary (accumulation-order robustness).
    near_thr = jnp.abs(v_ref - threshold) <= 1e-3
    assert bool(jnp.all((spike == s_ref) | near_thr))

    print("KERNEL_OK")
</pallas_src>

<mosaic_0001>
module attributes {stable_mosaic.version = 11 : i64} {
  func.func @_ttfs_lif_kernel(%arg0: i32, %arg1: memref<8x32xf32, #tpu.memory_space<vmem>>, %arg2: memref<32x128xf32, #tpu.memory_space<vmem>>, %arg3: memref<8x8xf32, #tpu.memory_space<vmem>>, %arg4: memref<8x128xf32, #tpu.memory_space<vmem>>, %arg5: memref<8x128xf32, #tpu.memory_space<vmem>>) attributes {dimension_semantics = [#tpu.dimension_semantics<parallel>], iteration_bounds = array<i64: 2>, scalar_prefetch = 0 : i64, scratch_operands = 0 : i64, tpu.core_type = #tpu.core_type<tc>, window_params = [{transform_indices = @transform_0, window_bounds = array<i64: 8, 32>}, {pipeline_mode = #tpu.pipeline_mode<synchronous>, transform_indices = @transform_1, window_bounds = array<i64: 32, 128>}, {pipeline_mode = #tpu.pipeline_mode<synchronous>, transform_indices = @transform_2, window_bounds = array<i64: 8, 8>}, {transform_indices = @transform_3, window_bounds = array<i64: 8, 128>}, {transform_indices = @transform_4, window_bounds = array<i64: 8, 128>}]} {
    %c0 = arith.constant 0 : index
    %c0_0 = arith.constant 0 : index
    %0 = vector.load %arg1[%c0, %c0_0] : memref<8x32xf32, #tpu.memory_space<vmem>>, vector<8x32xf32>
    %c0_1 = arith.constant 0 : index
    %c0_2 = arith.constant 0 : index
    %1 = vector.load %arg2[%c0_1, %c0_2] : memref<32x128xf32, #tpu.memory_space<vmem>>, vector<32x128xf32>
    %cst = arith.constant dense<0.000000e+00> : vector<8x128xf32>
    %2 = tpu.matmul %0, %1, %cst {dimension_numbers = #tpu.dot_dimension_numbers<[1], [0], [0], [1], [0, 0, 1, 1], [], []>} : vector<8x32xf32>, vector<32x128xf32>, vector<8x128xf32> -> vector<8x128xf32>
    %c0_3 = arith.constant 0 : index
    %c0_4 = arith.constant 0 : index
    %3 = vector.load %arg3[%c0_3, %c0_4] : memref<8x8xf32, #tpu.memory_space<vmem>>, vector<8x8xf32>
    %cst_5 = arith.constant dense<0.000000e+00> : vector<8x128xf32>
    %4 = tpu.matmul %3, %2, %cst_5 {dimension_numbers = #tpu.dot_dimension_numbers<[1], [0], [0], [1], [0, 0, 1, 1], [], []>} : vector<8x8xf32>, vector<8x128xf32>, vector<8x128xf32> -> vector<8x128xf32>
    %c0_6 = arith.constant 0 : index
    %c0_7 = arith.constant 0 : index
    %5 = vector.load %arg4[%c0_6, %c0_7] : memref<8x128xf32, #tpu.memory_space<vmem>>, vector<8x128xf32>
    tpu.vector_store %arg4[%c0_6, %c0_7], %4 {strides = array<i32>} : memref<8x128xf32, #tpu.memory_space<vmem>>, vector<8x128xf32>,
    %cst_8 = arith.constant 5.000000e-01 : f32
    %6 = vector.broadcast %cst_8 : f32 to vector<8x128xf32>
    %7 = arith.subf %4, %6 : vector<8x128xf32>
    %cst_9 = arith.constant 0.000000e+00 : f32
    %8 = vector.broadcast %cst_9 : f32 to vector<8x128xf32>
    %9 = arith.cmpf oge, %7, %8 : vector<8x128xf32>
    %cst_10 = arith.constant 1.000000e+00 : f32
    %cst_11 = arith.constant 0.000000e+00 : f32
    %10 = vector.broadcast %cst_10 : f32 to vector<8x128xf32>
    %11 = vector.broadcast %cst_11 : f32 to vector<8x128xf32>
    %12 = arith.select %9, %10, %11 : vector<8x128xi1>, vector<8x128xf32>
    %c0_12 = arith.constant 0 : index
    %c0_13 = arith.constant 0 : index
    %13 = vector.load %arg5[%c0_12, %c0_13] : memref<8x128xf32, #tpu.memory_space<vmem>>, vector<8x128xf32>
    tpu.vector_store %arg5[%c0_12, %c0_13], %12 {strides = array<i32>} : memref<8x128xf32, #tpu.memory_space<vmem>>, vector<8x128xf32>,
    return
  }
  func.func @transform_0(%arg0: i32) -> (i32, i32) {
    %c0_i32 = arith.constant 0 : i32
    %c0_i32_0 = arith.constant 0 : i32
    return %arg0, %c0_i32 : i32, i32
  }
  func.func @transform_1(%arg0: i32) -> (i32, i32) {
    %c0_i32 = arith.constant 0 : i32
    %c0_i32_0 = arith.constant 0 : i32
    %c0_i32_1 = arith.constant 0 : i32
    return %c0_i32, %c0_i32_0 : i32, i32
  }
  func.func @transform_2(%arg0: i32) -> (i32, i32) {
    %c0_i32 = arith.constant 0 : i32
    %c0_i32_0 = arith.constant 0 : i32
    %c0_i32_1 = arith.constant 0 : i32
    return %c0_i32, %c0_i32_0 : i32, i32
  }
  func.func @transform_3(%arg0: i32) -> (i32, i32) {
    %c0_i32 = arith.constant 0 : i32
    %c0_i32_0 = arith.constant 0 : i32
    return %arg0, %c0_i32 : i32, i32
  }
  func.func @transform_4(%arg0: i32) -> (i32, i32) {
    %c0_i32 = arith.constant 0 : i32
    %c0_i32_0 = arith.constant 0 : i32
    return %arg0, %c0_i32 : i32, i32
  }
}

</mosaic_0001>

<bundles_post_ra>
// kernel: tpu_custom_call.1
= control target key start
LH: loop header
LB: loop body
LE: loop exit
PB: predicated region body
PF: predicated region fallthrough
CT: control target
= control target key end

     0   :  { %10 = vsyncpa [#allocation3], 0  ;;  %s1121_s0 = inlined_call_operand.hbm [shape: f32[16,32], index: 0, kind: input, shape index: {}]   ;;  %s1122_s1 = inlined_call_operand.hbm [shape: f32[32,128], index: 1, kind: input, shape index: {}]   ;;  %s1123_s2 = inlined_call_operand.hbm [shape: f32[8,8], index: 2, kind: input, shape index: {}]   ;;  %s1124_s3 = inlined_call_operand.hbm [shape: f32[16,128], index: 3, kind: output, shape index: {0}]   ;;  %s1125_s4 = inlined_call_operand.hbm [shape: f32[16,128], index: 4, kind: output, shape index: {1}]  }
   0x1   :  { %12 = vsyncpa [#allocation3 + $0x1], 0 }
   0x2   :  { %13 = vsyncpa [#allocation6], 0 }
   0x3   :  { %14 = vsyncpa [#allocation4], 0 }
   0x4   :  { %16 = vsyncpa [#allocation4 + $0x1], 0 }
   0x5   :  { %17 = vsyncpa [#allocation10], 0 }
   0x6   :  { %19 = vsyncpa [#allocation10 + $0x1], 0  ;;  %s898_s15 = smov 0   ;;  %s900_s16 = smov 0  }
   0x7   :  { %s902_s17 = smov 0   ;;  %s904_s18 = smov 0  }
   0x8 LB: > { %s919_s19 = sadd.s32 4294967295, %s862_s18   ;;  %s563_s20 = sadd.s32 4294967294, %s862_s18   ;;  %s862_s18 = sphi %s904_s18, %s1147_s18   ;;  %s858_s17 = sphi %s902_s17, %s1146_s17   ;;  %s854_s16 = sphi %s900_s16, %s1145_s16   ;;  %s850_s15 = sphi %s898_s15, %s1144_s15  }
   0x9   : > { %p45_p0 = scmp.ne.s32.totalorder %s854_s16, %s850_s15  ;;  %p1126_p1 = scmp.eq.s32.totalorder %s919_s19, 0 }
   0xa   : > { %p117_p3 = scmp.eq.s32.totalorder %s563_s20, 1  ;;  %p564_p5 = scmp.ge.s32.totalorder %s862_s18, 1 }
   0xb   : > { %p928_p4 = por %p1126_p1, %p45_p0  ;;  %p150_p7 = scmp.lt.s32.totalorder %s862_s18, 3 }
   0xc   : > { %p933_p6 = por %p117_p3, %p45_p0  ;;  %s864_s24 = smov [#allocation5]  }
   0xd   : > { %s1130_s21 = scalar_select %p928_p4, 1, 0 }
   0xe   : > { %s1131_s22 = scalar_select %p933_p6, 1, 0 }
   0xf   : > { %p938_p8 = pnand %p564_p5, %p150_p7  ;;  %s162_s25 = sshll.u32 %s864_s24, 4  ;;  %s163_s25 = int_to_ptr.vmem [resolvable:$true] %s162_s25 }
  0x10   : > { %s865_s27 = smov [#allocation7]   ;;  %s695_s29 = scalar_lea.vmem %s163_s25, 512 }
  0x11   : > { %s1132_s23 = scalar_select %p938_p8, 1, 0 }
  0x12   : > { %p622_p9 = pneg %p938_p8  ;;  %s176_s28 = sshll.u32 %s865_s27, 4  ;;  %s177_s28 = int_to_ptr.vmem [resolvable:$true] %s176_s28 }
  0x13   : > { %p696_p13 = scmp.ne.s32.totalorder %s163_s25, %s695_s29  ;;  %p703_p5 = scmp.lt.s32.totalorder %s163_s25, %s163_s25 }
  0x14   : > { %p947_p11 = pnand %p622_p9, %p1126_p1  ;;  %p704_p7 = scmp.lt.s32.totalorder %s695_s29, %s695_s29 }
  0x16   : > { %p686_p12 = pneg %p947_p11  ;;  %p705_p10 = por %p704_p7, %p703_p5 }
  0x18   : > { %p698_p0 = pnand %p696_p13, %p686_p12 }
  0x1a   : > { %p699_p3 = pneg %p698_p0 }
  0x1c   : > { %p706_p9 = pnand %p705_p10, %p699_p3 }
  0x1e   : > { %709 = shalt.err (!%p706_p9)
}
  0x1f   : > { %s866_s30 = smov 128   ;;  %s867_s5 = smov 8  }
  0x20   : > { %625 = dma.hbm_to_vmem [thread:$0]  (!%p947_p11), %s1122_s1, 512, %s163_s25, [#allocation6], %s866_s30, %s866_s30, %s867_s5  }
  0x21   : > { %s721_s8 = scalar_lea.vmem %s177_s28, 128  ;;  %p729_p2 = scmp.lt.s32.totalorder %s177_s28, %s177_s28 }
  0x22   : > { %p722_p1 = scmp.ne.s32.totalorder %s177_s28, %s721_s8  ;;  %p730_p6 = scmp.lt.s32.totalorder %s721_s8, %s721_s8 }
  0x24   : > { %p724_p13 = pnand %p722_p1, %p686_p12  ;;  %p731_p5 = por %p730_p6, %p729_p2 }
  0x26   : > { %p725_p0 = pneg %p724_p13 }
  0x28   : > { %p732_p10 = pnand %p731_p5, %p725_p0 }
  0x2a   : > { %735 = shalt.err (!%p732_p10)
}
  0x2b   : > { %628 = dma.hbm_to_vmem [thread:$0]  (!%p947_p11), %s1123_s2, 128, %s177_s28, [#allocation6]  }
  0x2c   : > { %s970_s11 = sadd.s32 1, %s862_s18   ;;  %s32_s12 = sadd.s32 1, %s858_s17 }
  0x2d   : > { %s29_s13 = ssub.s32 %s862_s18, %s970_s11  ;;  %p39_p1 = scmp.ne.s32.totalorder %s858_s17, %s854_s16 }
  0x2e   : > { %p30_p2 = scmp.eq.s32.totalorder %s29_s13, 0  ;;  %p40_p6 = scmp.eq.s32.totalorder %s862_s18, 0 }
  0x2f   : > { %p1134_p12 = scmp.eq.s32.totalorder %s919_s19, 1  ;;  %p642_p7 = scmp.lt.s32.totalorder %s862_s18, 2 }
  0x30   : > { %s986_s20 = scalar_select %p30_p2, %s858_s17, %s32_s12  }
  0x31   : > { %p980_p3 = por %p1134_p12, %p39_p1  ;;  %p41_p9 = por %p40_p6, %p39_p1 }
  0x32   : > { %s187_s24 = sand.u32 1, %s858_s17   ;;  %s569_s26 = sshll.u32 %s862_s18, 7 }
  0x33   : > { %s1135_s14 = scalar_select %p980_p3, 1, 0 }
  0x34   : > { %s568_s25 = sshll.u32 %s187_s24, 3  ;;  %s993_s29 = scalar_lea.hbm %s1121_s0, %s569_s26 }
  0x35   : > { %s191_s30 = scalar_lea.vmem [#allocation2], %s568_s25  ;;  %p995_p11 = pnand %p642_p7, %p41_p9 }
  0x36   : > { %s198_s5 = sshll.u32 %s191_s30, 4  ;;  %s188_s7 = scalar_lea.sflag [#allocation3], %s187_s24  ;;  %s199_s5 = int_to_ptr.vmem [resolvable:$true] %s198_s5 }
  0x37   : > { %s736_s8 = scalar_lea.hbm %s993_s29, 128  ;;  %p738_p0 = pneg %p995_p11 }
  0x38   : > { %p737_p13 = scmp.ne.s32.totalorder %s993_s29, %s736_s8  ;;  %s741_s12 = scalar_lea.hbm %s1121_s0, 256 }
  0x39   : > { %p742_p1 = scmp.lt.s32.totalorder %s993_s29, %s1121_s0  ;;  %p743_p2 = scmp.lt.s32.totalorder %s741_s12, %s736_s8 }
  0x3a   : > { %p739_p5 = pnand %p738_p0, %p737_p13 }
  0x3b   : > { %p744_p6 = por %p743_p2, %p742_p1 }
  0x3c   : > { %p740_p10 = pneg %p739_p5 }
  0x3e   : > { %p745_p12 = pnand %p744_p6, %p740_p10 }
  0x40   : > { %748 = shalt.err (!%p745_p12)
}
  0x41   : > { %s749_s26 = scalar_lea.vmem %s199_s5, 128  ;;  %s868_s24 = smov [#allocation2]  }
  0x42   : > { %p750_p7 = scmp.ne.s32.totalorder %s199_s5, %s749_s26  ;;  %s754_s27 = sshll.u32 %s868_s24, 4  ;;  %s755_s27 = int_to_ptr.vmem [resolvable:$false] %s754_s27 }
  0x43   : > { %s756_s28 = scalar_lea.vmem %s755_s27, 256  ;;  %p757_p13 = scmp.lt.s32.totalorder %s199_s5, %s755_s27 }
  0x44   : > { %p752_p9 = pnand %p750_p7, %p738_p0  ;;  %p758_p5 = scmp.lt.s32.totalorder %s756_s28, %s749_s26 }
  0x46   : > { %p753_p3 = pneg %p752_p9  ;;  %p759_p4 = por %p758_p5, %p757_p13 }
  0x48   : > { %p760_p8 = pnand %p759_p4, %p753_p3 }
  0x4a   : > { %763 = shalt.err (!%p760_p8)
}
  0x4b   : > { %632 = dma.hbm_to_vmem [thread:$0]  (!%p995_p11), %s993_s29, 128, %s199_s5, %s188_s7  }
  0x4c   : > { %p1137_p10 = scmp.ne.s32.totalorder %s1132_s23, 0 }
  0x4d   : > { %s1016_s30 = sand.u32 (!%p1137_p10), 1, %s854_s16   ;;  %p1138_p4 = scmp.ne.s32.totalorder (!%p1137_p10), %s1130_s21, 0 }
  0x4e   : > { %207 = sbr.rel (%p1137_p10) target bundleno = 520 (0x208), region = 32  ;;  %s1019_s8 = sshll.u32 (!%p1137_p10), %s1016_s30, 3 }
  0x4f   : > { %s210_s9 = scalar_lea.sflag (!%p1137_p10), [#allocation3], %s1016_s30  ;;  %s213_s10 = scalar_lea.vmem (!%p1137_p10), [#allocation2], %s1019_s8 }
  0x53   : > { %833 = dma.done.wait (%p1138_p4), %s210_s9, 128  }
  0x54   : > { %835 = vsyncadd (%p1138_p4), %s210_s9, 4294967168  ;;  %p1139_p8 = scmp.eq.s32.totalorder %s919_s19, 0 }
  0x56   : > { %837 = dma.done.wait (%p1139_p8), [#allocation6], 640   ;;  %p1140_p3 = pmov %p1139_p8 }
  0x57   : > { %v869_v0 = vmov 0.0   ;;  %vm870_vm0 = vmmov 0   ;;  %v255_v1 = vld [vmem:[#allocation5 + $0x18] sm:$0xff]  ;;  %v254_v2 = vld [vmem:[#allocation5 + $0x10] sm:$0xff]  ;;  %v253_v3 = vld [vmem:[#allocation5 + $0x8] sm:$0xff]  ;;  %vm256_vm1 = vcmask 261120  }
  0x58   : > { %839 = vsyncadd (%p1140_p3), [#allocation6], 4294966656  ;;  %592 = vmatprep.subr.mxu0 %v869_v0  ;;  %600 = vmatprep.mubr.msk.f32.mxu0 %vm870_vm0, %v869_v0  ;;  %v252_v4 = vld [vmem:[#allocation5] sm:$0xff]  ;;  %v251_v5 = vld [vmem:[%s213_s10] sm:$0xff]  ;;  %vm331_vm2 = vcmask 64512   ;;  %s243_s21 = scalar_lea.vmem [#allocation8], %s1019_s8 }
  0x59   : > { %603 = vmatprep.subr.mxu1 %v869_v0  ;;  %605 = vmatprep.mubr.msk.f32.mxu1 %vm870_vm0, %v869_v0  ;;  %v330_v6 = vld [vmem:[#allocation7] sm:$0xff]  ;;  %s429_s23 = sshll.u32 %s243_s21, 4  ;;  %s581_s29 = sshll.u32 %s919_s19, 7  ;;  %s1040_s23 = int_to_ptr.vmem [resolvable:$true] %s429_s23 }
  0x5a   : > { %593 = vmatpush3.msra.mxu0 %v255_v1  ;;  %s1047_s7 = scalar_lea.hbm %s1124_s3, %s581_s29  ;;  %s250_s12 = scalar_lea.vmem [#allocation9], %s1019_s8 }
  0x5b   : > { %594 = vmatprep.subr.mxu0 %v869_v0  ;;  %s1052_s13 = sshll.u32 %s250_s12, 4  ;;  %s411_s25 = scalar_lea.sflag [#allocation4], %s1016_s30  ;;  %s443_s13 = int_to_ptr.vmem [resolvable:$true] %s1052_s13 }
  0x5c   : > { %595 = vmatpush3.msra.mxu0 %v254_v2  ;;  %s764_s26 = scalar_lea.vmem %s1040_s23, 128  ;;  %p1141_p0 = scmp.ne.s32.totalorder %s1135_s14, 0 }
  0x5d   : > { %596 = vmatprep.subr.mxu0 %v869_v0  ;;  %p765_p11 = scmp.ne.s32.totalorder %s1040_s23, %s764_s26  ;;  %s871_s24 = smov [#allocation8]  }
  0x5e   : > { %597 = vmatpush3.msra.mxu0 %v253_v3  ;;  %s768_s27 = sshll.u32 %s871_s24, 4  ;;  %s769_s27 = int_to_ptr.vmem [resolvable:$false] %s768_s27 }
  0x5f   : > { %598 = vmatprep.subr.mxu0 %v869_v0  ;;  %p766_p1 = pnand %p765_p11, %p1141_p0  ;;  %s770_s28 = scalar_lea.vmem %s769_s27, 256 }
  0x60   : > { %599 = vmatpush3.msra.mxu0 %v252_v4  ;;  %p771_p6 = scmp.lt.s32.totalorder %s1040_s23, %s769_s27  ;;  %p772_p12 = scmp.lt.s32.totalorder %s770_s28, %s764_s26 }
  0x61   : > { %601 = vmatmul.mubr.msk.f32.vlgmr.msra.gmra.mxu0 %vm256_vm1, %v251_v5  ;;  %p767_p2 = pneg %p766_p1 }
  0x62   : > { %p773_p7 = por %p772_p12, %p771_p6 }
  0x64   : > { %p774_p9 = pnand %p773_p7, %p767_p2 }
 0x121   : > { %v326_v7 = vpop.f32.mrf.mxu0 }
 0x122   : > { %604 = vmatpush3.msra.mxu1 %v326_v7 }
 0x123   : > { %v602_v8 = vpop.f32.mrf.mxu0  ;;  %606 = vmatmul.mubr.msk.f32.vlgmr.msra.gmra.mxu1 %vm331_vm2, %v330_v6 }
 0x1e3   : > { %v401_v9 = vpop.f32.mrf.mxu1 }
 0x1e4   : > { %405 = vst [vmem:[%s243_s21] sm:$0xff] %v401_v9  ;;  %v578_v10 = vadd.f32 -0.5, %v401_v9 }
 0x1e5   : > { %v607_v11 = vpop.f32.mrf.mxu1 }
 0x1e6   : > { %777 = shalt.err (!%p774_p9)
}
 0x1e7   : > { %s778_s9 = scalar_lea.hbm %s1047_s7, 128  ;;  %s782_s5 = scalar_lea.hbm %s1124_s3, 256 }
 0x1e8   : > { %p779_p13 = scmp.ne.s32.totalorder %s1047_s7, %s778_s9  ;;  %p783_p4 = scmp.lt.s32.totalorder %s1047_s7, %s1124_s3 }
 0x1e9   : > { %p784_p8 = scmp.lt.s32.totalorder %s782_s5, %s778_s9 }
 0x1ea   : > { %p780_p5 = pnand %p779_p13, %p1141_p0 }
 0x1eb   : > { %p785_p3 = por %p784_p8, %p783_p4 }
 0x1ec   : > { %p781_p10 = pneg %p780_p5 }
 0x1ee   : > { %p786_p11 = pnand %p785_p3, %p781_p10 }
 0x1f0   : > { %789 = shalt.err (!%p786_p11)
}
 0x1f1   : > { %618 = dma.vmem_to_hbm [thread:$0]  (%p1141_p0), %s1040_s23, 128, %s1047_s7, %s411_s25   ;;  %vm407_vm3 = vcmp.ge.f32.partialorder %v578_v10, 0.0 }
 0x1f2   : > { %s1080_s28 = scalar_lea.hbm %s1125_s4, %s581_s29  ;;  %v408_v12 = vsel %vm407_vm3, 1.0, %v869_v0  ;;  %s416_s9 = scalar_lea.sflag [#allocation10], %s1016_s30 }
 0x1f3   : > { %409 = vst [vmem:[%s250_s12] sm:$0xff] %v408_v12  ;;  %s790_s10 = scalar_lea.vmem %s443_s13, 128  ;;  %s872_s21 = smov [#allocation9]  }
 0x1f4   : > { %p791_p1 = scmp.ne.s32.totalorder %s443_s13, %s790_s10  ;;  %s794_s23 = sshll.u32 %s872_s21, 4  ;;  %s795_s23 = int_to_ptr.vmem [resolvable:$false] %s794_s23 }
 0x1f5   : > { %s796_s19 = scalar_lea.vmem %s795_s23, 256  ;;  %p797_p12 = scmp.lt.s32.totalorder %s443_s13, %s795_s23 }
 0x1f6   : > { %p792_p2 = pnand %p791_p1, %p1141_p0  ;;  %p798_p7 = scmp.lt.s32.totalorder %s796_s19, %s790_s10 }
 0x1f8   : > { %p793_p6 = pneg %p792_p2  ;;  %p799_p9 = por %p798_p7, %p797_p12 }
 0x1fa   : > { %p800_p13 = pnand %p799_p9, %p793_p6 }
 0x1fc   : > { %803 = shalt.err (!%p800_p13)
}
 0x1fd   : > { %s804_s8 = scalar_lea.hbm %s1080_s28, 128  ;;  %s808_s7 = scalar_lea.hbm %s1125_s4, 256 }
 0x1fe   : > { %p805_p5 = scmp.ne.s32.totalorder %s1080_s28, %s804_s8  ;;  %p809_p8 = scmp.lt.s32.totalorder %s1080_s28, %s1125_s4 }
 0x1ff   : > { %p810_p3 = scmp.lt.s32.totalorder %s808_s7, %s804_s8 }
 0x200   : > { %p806_p10 = pnand %p805_p5, %p1141_p0 }
 0x201   : > { %p811_p11 = por %p810_p3, %p809_p8 }
 0x202   : > { %p807_p4 = pneg %p806_p10 }
 0x204   : > { %p812_p1 = pnand %p811_p11, %p807_p4 }
 0x206   : > { %815 = shalt.err (!%p812_p1)
}
 0x207   : > { %619 = dma.vmem_to_hbm [thread:$0]  (%p1141_p0), %s443_s13, 128, %s1080_s28, %s416_s9  }
 0x208 PF: > { %s454_s5 = sand.u32 1, %s850_s15   ;;  %p1142_p2 = scmp.ne.s32.totalorder %s1131_s22, 0 }
 0x209   : > { %p1143_p6 = scmp.ge.s32.totalorder %s862_s18, 2  ;;  %s455_s6 = scalar_lea.sflag [#allocation4], %s454_s5 }
 0x20b   : > { %p634_p12 = pnand %p1143_p6, %p1142_p2 }
 0x20d   : > { %p635_p7 = pneg %p634_p12 }
 0x20f   : > { %841 = dma.done.wait (%p635_p7), %s455_s6, 128  }
 0x210   : > { %843 = vsyncadd (%p635_p7), %s455_s6, 4294967168  ;;  %s464_s24 = scalar_lea.sflag [#allocation10], %s454_s5 }
 0x211   : > { %845 = dma.done.wait (%p635_p7), %s464_s24, 128  }
 0x212   : > { %847 = vsyncadd (%p635_p7), %s464_s24, 4294967168  ;;  %p22_p0 = scmp.ge.s32.totalorder %s970_s11, 4   ;;  %s1144_s15 = smov %s854_s16 }
 0x213   : > { %s1145_s16 = smov %s858_s17  ;;  %s1146_s17 = smov %s986_s20 }
 0x214   : > { %s1147_s18 = smov %s970_s11  ;;  %24 = sbr.rel (!%p22_p0) target bundleno = 8 (0x8), region = 102 }
 0x219   :  { %469 = vsyncpa [#allocation3], 1 }
 0x21a   :  { %471 = vsyncpa [#allocation3 + $0x1], 1 }
 0x21b   :  { %472 = vsyncpa [#allocation6], 1 }
 0x21c   :  { %473 = vsyncpa [#allocation4], 1 }
 0x21d   :  { %475 = vsyncpa [#allocation4 + $0x1], 1 }
 0x21e   :  { %476 = vsyncpa [#allocation10], 1 }
 0x21f   :  { %478 = vsyncpa [#allocation10 + $0x1], 1 }

</bundles_post_ra>
